<compile_context>
chip_gen: v5e
topology: v5e:2x2
jax: 0.10.0
libtpu: 0.0.40
codegen_flags: <defaults>
</compile_context>

<pallas_src>
import jax
import jax.numpy as jnp
from jax.experimental import pallas as pl
from jax.experimental.pallas import tpu as pltpu


def _round_up(x, m):
    return (x + m - 1) // m * m


def _vmem_limit(est_bytes):
    # Generous headroom, floor at 16 MiB, but stay inside v7x's 64 MiB physical VMEM.
    return int(min(max(2 * est_bytes, 16 * 1024 * 1024), 48 * 1024 * 1024))


# ----------------- Kernel 1: projection  XW = X @ W  (bf16 in, f32 acc, bf16 out) ----
def project_kernel(x_ref, w_ref, o_ref):
    o_ref[...] = jnp.dot(
        x_ref[...], w_ref[...], preferred_element_type=jnp.float32
    ).astype(o_ref.dtype)


# ----------------- Kernel 2: aggregation  OUT = PReLU(A @ XW + b) --------------------
# Grid = (rows, k).  XW is a single VMEM-resident block (constant index_map), the
# output block (i) is constant over k, so it doubles as the f32 accumulator.
def aggregate_kernel(a_ref, xw_ref, b_ref, alpha_ref, o_ref):
    k = pl.program_id(1)
    tk = a_ref.shape[1]  # static block size

    @pl.when(k == 0)
    def _():
        o_ref[...] = jnp.zeros_like(o_ref)

    k_start = pl.multiple_of(k * tk, tk)
    xw_blk = xw_ref[pl.ds(k_start, tk), :]
    o_ref[...] += jnp.dot(a_ref[...], xw_blk, preferred_element_type=jnp.float32)

    @pl.when(k == pl.num_programs(1) - 1)
    def _():
        h = o_ref[...] + b_ref[...]  # bias broadcast over rows
        # PReLU: max(h,0) + alpha * min(h,0)  (pure VPU, hidden under MXU/DMA)
        o_ref[...] = jnp.maximum(h, 0.0) + alpha_ref[...] * jnp.minimum(h, 0.0)


def encoder2_forward(x, edge_index, weights, W, bias, alpha):
    """x: (N, F) f32, edge_index: (2, E) i32, weights: (E,) f32,
    W: (F, H), bias: (H,), alpha: (H,).  Returns (N, H) f32."""
    N, F = x.shape
    H = W.shape[1]

    # ---- Padded / tiled geometry (128-aligned; no lcm blowup).
    F_pad = _round_up(F, 128)
    H_pad = _round_up(H, 128)             # tn == H_pad: A is read exactly once
    N_pad = _round_up(N, 128)
    tm = min(512, N_pad)                  # output-row tile
    N_pad = _round_up(N_pad, tm)          # tm | N_pad, worst-case extra pad < tm
    tk = tm                               # contraction (source-node) tile
    while tk * 2 <= min(1024, N_pad) and N_pad % (tk * 2) == 0:
        tk *= 2

    # ---- Glue: zero-pad operands (bf16 for MXU), densify A[dst, src] += w in bf16.
    x_p = jnp.zeros((N_pad, F_pad), jnp.bfloat16).at[:N, :F].set(x.astype(jnp.bfloat16))
    W_p = jnp.zeros((F_pad, H_pad), jnp.bfloat16).at[:F, :H].set(W.astype(jnp.bfloat16))
    b_p = jnp.zeros((1, H_pad), jnp.float32).at[0, :H].set(bias.astype(jnp.float32))
    al_p = jnp.zeros((1, H_pad), jnp.float32).at[0, :H].set(alpha.astype(jnp.float32))
    A = (
        jnp.zeros((N_pad, N_pad), jnp.bfloat16)
        .at[edge_index[1], edge_index[0]]
        .add(weights.astype(jnp.bfloat16))
    )

    # ---- Phase 1: XW = X @ W, computed once, emitted in bf16 for the aggregation.
    est1 = 2 * tm * F_pad * 2 + 2 * F_pad * H_pad * 2 + 2 * tm * H_pad * 2
    xw = pl.pallas_call(
        project_kernel,
        out_shape=jax.ShapeDtypeStruct((N_pad, H_pad), jnp.bfloat16),
        grid=(N_pad // tm,),
        in_specs=[
            pl.BlockSpec((tm, F_pad), lambda i: (i, 0)),
            pl.BlockSpec((F_pad, H_pad), lambda i: (0, 0)),
        ],
        out_specs=pl.BlockSpec((tm, H_pad), lambda i: (i, 0)),
        compiler_params=pltpu.CompilerParams(
            dimension_semantics=("parallel",),
            vmem_limit_bytes=_vmem_limit(est1),
        ),
    )(x_p, W_p)

    # ---- Phase 2: OUT = PReLU(A @ XW + b), XW VMEM-resident, output = accumulator.
    est2 = (
        2 * tm * tk * 2          # A tiles, double-buffered, bf16
        + 2 * N_pad * H_pad * 2  # resident XW (worst case double-buffered), bf16
        + 2 * tm * H_pad * 4     # output tile, double-buffered, f32
        + 4 * H_pad * 4          # bias + alpha
    )
    out = pl.pallas_call(
        aggregate_kernel,
        out_shape=jax.ShapeDtypeStruct((N_pad, H_pad), jnp.float32),
        grid=(N_pad // tm, N_pad // tk),
        in_specs=[
            pl.BlockSpec((tm, tk), lambda i, k: (i, k)),          # A tile (bf16)
            pl.BlockSpec((N_pad, H_pad), lambda i, k: (0, 0)),    # XW resident (bf16)
            pl.BlockSpec((1, H_pad), lambda i, k: (0, 0)),        # bias (f32)
            pl.BlockSpec((1, H_pad), lambda i, k: (0, 0)),        # alpha (f32)
        ],
        out_specs=pl.BlockSpec((tm, H_pad), lambda i, k: (i, 0)),
        compiler_params=pltpu.CompilerParams(
            dimension_semantics=("parallel", "arbitrary"),
            vmem_limit_bytes=_vmem_limit(est2),
        ),
    )(A, xw, b_p, al_p)

    return out[:N, :H]


def reference_forward(x, edge_index, weights, W, bias, alpha):
    """Pure-JAX f32 reference of the same math."""
    N = x.shape[0]
    src, dst = edge_index[0], edge_index[1]
    A = jnp.zeros((N, N), jnp.float32).at[dst, src].add(weights)
    h = A @ (x @ W) + bias[None, :]
    return jnp.where(h > 0, h, alpha[None, :] * h)


if __name__ == "__main__":
    key = jax.random.PRNGKey(0)
    k_x, k_w, k_e, k_ew = jax.random.split(key, 4)

    # Small synthetic graph: N nodes, F in_channels, H hidden_channels, E edges.
    N, F, H, E = 64, 16, 32, 256

    x = jax.random.normal(k_x, (N, F), dtype=jnp.float32)
    edge_index = jax.random.randint(k_e, (2, E), 0, N, dtype=jnp.int32)
    weights = jax.random.uniform(k_ew, (E,), dtype=jnp.float32)

    # Parameter init per GCNConv (glorot-ish) + PReLU(hidden_channels) slope 0.25.
    limit = (6.0 / (F + H)) ** 0.5
    W = jax.random.uniform(k_w, (F, H), minval=-limit, maxval=limit, dtype=jnp.float32)
    bias = jnp.zeros((H,), dtype=jnp.float32)
    alpha = jnp.full((H,), 0.25, dtype=jnp.float32)

    fwd = jax.jit(encoder2_forward)
    out = fwd(x, edge_index, weights, W, bias, alpha)
    out = jax.block_until_ready(out)

    ref = reference_forward(x, edge_index, weights, W, bias, alpha)
    assert out.shape == (N, H)
    # Tolerance reflects bf16 MXU inputs (f32 accumulation).
    assert jnp.allclose(out, ref, atol=5e-2, rtol=5e-2)

    print("KERNEL_OK")
</pallas_src>

<mosaic_0001>
module attributes {stable_mosaic.version = 11 : i64} {
  func.func @project_kernel(%arg0: i32, %arg1: memref<128x128xbf16, #tpu.memory_space<vmem>>, %arg2: memref<128x128xbf16, #tpu.memory_space<vmem>>, %arg3: memref<128x128xbf16, #tpu.memory_space<vmem>>) attributes {dimension_semantics = [#tpu.dimension_semantics<parallel>], iteration_bounds = array<i64: 1>, scalar_prefetch = 0 : i64, scratch_operands = 0 : i64, tpu.core_type = #tpu.core_type<tc>, window_params = [{transform_indices = @transform_0, window_bounds = array<i64: 128, 128>}, {pipeline_mode = #tpu.pipeline_mode<synchronous>, transform_indices = @transform_1, window_bounds = array<i64: 128, 128>}, {transform_indices = @transform_2, window_bounds = array<i64: 128, 128>}]} {
    %c0 = arith.constant 0 : index
    %c0_0 = arith.constant 0 : index
    %0 = vector.load %arg1[%c0, %c0_0] : memref<128x128xbf16, #tpu.memory_space<vmem>>, vector<128x128xbf16>
    %c0_1 = arith.constant 0 : index
    %c0_2 = arith.constant 0 : index
    %1 = vector.load %arg2[%c0_1, %c0_2] : memref<128x128xbf16, #tpu.memory_space<vmem>>, vector<128x128xbf16>
    %cst = arith.constant dense<0.000000e+00> : vector<128x128xf32>
    %2 = tpu.matmul %0, %1, %cst {dimension_numbers = #tpu.dot_dimension_numbers<[1], [0], [0], [1], [0, 0, 1, 1], [], []>} : vector<128x128xbf16>, vector<128x128xbf16>, vector<128x128xf32> -> vector<128x128xf32>
    %3 = arith.truncf %2 : vector<128x128xf32> to vector<128x128xbf16>
    %c0_3 = arith.constant 0 : index
    %c0_4 = arith.constant 0 : index
    %4 = vector.load %arg3[%c0_3, %c0_4] : memref<128x128xbf16, #tpu.memory_space<vmem>>, vector<128x128xbf16>
    tpu.vector_store %arg3[%c0_3, %c0_4], %3 {strides = array<i32>} : memref<128x128xbf16, #tpu.memory_space<vmem>>, vector<128x128xbf16>,
    return
  }
  func.func @transform_0(%arg0: i32) -> (i32, i32) {
    %c0_i32 = arith.constant 0 : i32
    %c0_i32_0 = arith.constant 0 : i32
    return %arg0, %c0_i32 : i32, i32
  }
  func.func @transform_1(%arg0: i32) -> (i32, i32) {
    %c0_i32 = arith.constant 0 : i32
    %c0_i32_0 = arith.constant 0 : i32
    %c0_i32_1 = arith.constant 0 : i32
    return %c0_i32, %c0_i32_0 : i32, i32
  }
  func.func @transform_2(%arg0: i32) -> (i32, i32) {
    %c0_i32 = arith.constant 0 : i32
    %c0_i32_0 = arith.constant 0 : i32
    return %arg0, %c0_i32 : i32, i32
  }
}

module attributes {stable_mosaic.version = 11 : i64} {
  func.func @aggregate_kernel(%arg0: i32, %arg1: i32, %arg2: memref<128x128xbf16, #tpu.memory_space<vmem>>, %arg3: memref<128x128xbf16, #tpu.memory_space<vmem>>, %arg4: memref<1x128xf32, #tpu.memory_space<vmem>>, %arg5: memref<1x128xf32, #tpu.memory_space<vmem>>, %arg6: memref<128x128xf32, #tpu.memory_space<vmem>>) attributes {dimension_semantics = [#tpu.dimension_semantics<parallel>, #tpu.dimension_semantics<arbitrary>], iteration_bounds = array<i64: 1, 1>, scalar_prefetch = 0 : i64, scratch_operands = 0 : i64, tpu.core_type = #tpu.core_type<tc>, window_params = [{transform_indices = @transform_0, window_bounds = array<i64: 128, 128>}, {pipeline_mode = #tpu.pipeline_mode<synchronous>, transform_indices = @transform_1, window_bounds = array<i64: 128, 128>}, {pipeline_mode = #tpu.pipeline_mode<synchronous>, transform_indices = @transform_2, window_bounds = array<i64: 1, 128>}, {pipeline_mode = #tpu.pipeline_mode<synchronous>, transform_indices = @transform_3, window_bounds = array<i64: 1, 128>}, {transform_indices = @transform_4, window_bounds = array<i64: 128, 128>}]} {
    %c0_i32 = arith.constant 0 : i32
    %0 = arith.cmpi eq, %arg1, %c0_i32 : i32
    %1 = arith.extui %0 : i1 to i32
    %c0_i32_0 = arith.constant 0 : i32
    %2 = arith.cmpi ne, %1, %c0_i32_0 : i32
    scf.if %2 {
      %cst_9 = arith.constant 0.000000e+00 : f32
      %15 = vector.broadcast %cst_9 : f32 to vector<128x128xf32>
      %c0_10 = arith.constant 0 : index
      %c0_11 = arith.constant 0 : index
      %16 = vector.load %arg6[%c0_10, %c0_11] : memref<128x128xf32, #tpu.memory_space<vmem>>, vector<128x128xf32>
      tpu.vector_store %arg6[%c0_10, %c0_11], %15 {strides = array<i32>} : memref<128x128xf32, #tpu.memory_space<vmem>>, vector<128x128xf32>,
    } else {
    }
    %c128_i32 = arith.constant 128 : i32
    %3 = arith.muli %arg1, %c128_i32 : i32
    %4 = tpu.assume_multiple %3, 128 : i32
    %5 = arith.index_cast %4 : i32 to index
    %c0 = arith.constant 0 : index
    %6 = vector.load %arg3[%5, %c0] : memref<128x128xbf16, #tpu.memory_space<vmem>>, vector<128x128xbf16>
    %c0_1 = arith.constant 0 : index
    %c0_2 = arith.constant 0 : index
    %7 = vector.load %arg6[%c0_1, %c0_2] : memref<128x128xf32, #tpu.memory_space<vmem>>, vector<128x128xf32>
    %c0_3 = arith.constant 0 : index
    %c0_4 = arith.constant 0 : index
    %8 = vector.load %arg2[%c0_3, %c0_4] : memref<128x128xbf16, #tpu.memory_space<vmem>>, vector<128x128xbf16>
    %cst = arith.constant dense<0.000000e+00> : vector<128x128xf32>
    %9 = tpu.matmul %8, %6, %cst {dimension_numbers = #tpu.dot_dimension_numbers<[1], [0], [0], [1], [0, 0, 1, 1], [], []>} : vector<128x128xbf16>, vector<128x128xbf16>, vector<128x128xf32> -> vector<128x128xf32>
    %10 = arith.addf %7, %9 : vector<128x128xf32>
    %c0_5 = arith.constant 0 : index
    %c0_6 = arith.constant 0 : index
    %11 = vector.load %arg6[%c0_5, %c0_6] : memref<128x128xf32, #tpu.memory_space<vmem>>, vector<128x128xf32>
    tpu.vector_store %arg6[%c0_5, %c0_6], %10 {strides = array<i32>} : memref<128x128xf32, #tpu.memory_space<vmem>>, vector<128x128xf32>,
    %c0_i32_7 = arith.constant 0 : i32
    %12 = arith.cmpi eq, %arg1, %c0_i32_7 : i32
    %13 = arith.extui %12 : i1 to i32
    %c0_i32_8 = arith.constant 0 : i32
    %14 = arith.cmpi ne, %13, %c0_i32_8 : i32
    scf.if %14 {
      %c0_9 = arith.constant 0 : index
      %c0_10 = arith.constant 0 : index
      %15 = vector.load %arg6[%c0_9, %c0_10] : memref<128x128xf32, #tpu.memory_space<vmem>>, vector<128x128xf32>
      %c0_11 = arith.constant 0 : index
      %c0_12 = arith.constant 0 : index
      %16 = vector.load %arg4[%c0_11, %c0_12] : memref<1x128xf32, #tpu.memory_space<vmem>>, vector<1x128xf32>
      %17 = vector.broadcast %16 : vector<1x128xf32> to vector<128x128xf32>
      %18 = arith.addf %15, %17 : vector<128x128xf32>
      %cst_13 = arith.constant 0.000000e+00 : f32
      %19 = vector.broadcast %cst_13 : f32 to vector<128x128xf32>
      %20 = arith.maximumf %18, %19 : vector<128x128xf32>
      %c0_14 = arith.constant 0 : index
      %c0_15 = arith.constant 0 : index
      %21 = vector.load %arg5[%c0_14, %c0_15] : memref<1x128xf32, #tpu.memory_space<vmem>>, vector<1x128xf32>
      %cst_16 = arith.constant 0.000000e+00 : f32
      %22 = vector.broadcast %cst_16 : f32 to vector<128x128xf32>
      %23 = arith.minimumf %18, %22 : vector<128x128xf32>
      %24 = vector.broadcast %21 : vector<1x128xf32> to vector<128x128xf32>
      %25 = arith.mulf %24, %23 : vector<128x128xf32>
      %26 = arith.addf %20, %25 : vector<128x128xf32>
      %c0_17 = arith.constant 0 : index
      %c0_18 = arith.constant 0 : index
      %27 = vector.load %arg6[%c0_17, %c0_18] : memref<128x128xf32, #tpu.memory_space<vmem>>, vector<128x128xf32>
      tpu.vector_store %arg6[%c0_17, %c0_18], %26 {strides = array<i32>} : memref<128x128xf32, #tpu.memory_space<vmem>>, vector<128x128xf32>,
    } else {
    }
    return
  }
  func.func @transform_0(%arg0: i32, %arg1: i32) -> (i32, i32) {
    %c0_i32 = arith.constant 0 : i32
    return %arg0, %arg1 : i32, i32
  }
  func.func @transform_1(%arg0: i32, %arg1: i32) -> (i32, i32) {
    %c0_i32 = arith.constant 0 : i32
    %c0_i32_0 = arith.constant 0 : i32
    %c0_i32_1 = arith.constant 0 : i32
    return %c0_i32, %c0_i32_0 : i32, i32
  }
  func.func @transform_2(%arg0: i32, %arg1: i32) -> (i32, i32) {
    %c0_i32 = arith.constant 0 : i32
    %c0_i32_0 = arith.constant 0 : i32
    %c0_i32_1 = arith.constant 0 : i32
    return %c0_i32, %c0_i32_0 : i32, i32
  }
  func.func @transform_3(%arg0: i32, %arg1: i32) -> (i32, i32) {
    %c0_i32 = arith.constant 0 : i32
    %c0_i32_0 = arith.constant 0 : i32
    %c0_i32_1 = arith.constant 0 : i32
    return %c0_i32, %c0_i32_0 : i32, i32
  }
  func.func @transform_4(%arg0: i32, %arg1: i32) -> (i32, i32) {
    %c0_i32 = arith.constant 0 : i32
    %c0_i32_0 = arith.constant 0 : i32
    return %arg0, %c0_i32 : i32, i32
  }
}

</mosaic_0001>

<bundles_post_ra>
// kernel: encoder2_forward.2
= control target key start
LH: loop header
LB: loop body
LE: loop exit
PB: predicated region body
PF: predicated region fallthrough
CT: control target
= control target key end

     0   :  { %s462_s1 = inlined_call_operand.vmem [shape: bf16[128,128], index: 1, kind: input, shape index: {}]   ;;  %s463_s0 = inlined_call_operand.vmem [shape: bf16[128,128], index: 0, kind: input, shape index: {}]   ;;  %s464_s2 = inlined_call_operand.vmem [shape: bf16[128,128], index: 2, kind: output, shape index: {}]  }
   0x1   :  { %v303_v0 = vld [vmem:[%s462_s1 + $0x38] sm:$0xff]  ;;  %v302_v1 = vld [vmem:[%s462_s1 + $0x30] sm:$0xff]  ;;  %v301_v2 = vld [vmem:[%s462_s1 + $0x28] sm:$0xff] }
   0x2   :  { %139 = vmatpush.bf16.msra.mxu0 %v303_v0  ;;  %351 = vmatpush.bf16.msra.mxu1 %v303_v0  ;;  %v300_v3 = vld [vmem:[%s462_s1 + $0x20] sm:$0xff]  ;;  %v299_v4 = vld [vmem:[%s462_s1 + $0x18] sm:$0xff]  ;;  %v298_v5 = vld [vmem:[%s462_s1 + $0x10] sm:$0xff] }
   0x3   :  { %352 = vmatpush.bf16.msra.mxu2 %v303_v0  ;;  %353 = vmatpush.bf16.msra.mxu3 %v303_v0  ;;  %v297_v6 = vld [vmem:[%s462_s1 + $0x8] sm:$0xff]  ;;  %v296_v7 = vld [vmem:[%s462_s1] sm:$0xff]  ;;  %v290_v9 = vld [vmem:[%s463_s0 + $0x10] sm:$0xff] }
   0x4   :  { %v288_v8 = vld [vmem:[%s463_s0] sm:$0xff]  ;;  %v294_v11 = vld [vmem:[%s463_s0 + $0x30] sm:$0xff]  ;;  %v289_v12 = vld [vmem:[%s463_s0 + $0x8] sm:$0xff] }
   0x5   :  { %v292_v10 = vld [vmem:[%s463_s0 + $0x20] sm:$0xff]  ;;  %v291_v13 = vld [vmem:[%s463_s0 + $0x18] sm:$0xff]  ;;  %v293_v14 = vld [vmem:[%s463_s0 + $0x28] sm:$0xff] }
   0x6   :  { %140 = vmatpush.bf16.msra.mxu0 %v302_v1  ;;  %354 = vmatpush.bf16.msra.mxu1 %v302_v1  ;;  %v295_v15 = vld [vmem:[%s463_s0 + $0x38] sm:$0xff] }
   0x7   :  { %355 = vmatpush.bf16.msra.mxu2 %v302_v1  ;;  %356 = vmatpush.bf16.msra.mxu3 %v302_v1 }
   0xa   :  { %141 = vmatpush.bf16.msra.mxu0 %v301_v2  ;;  %357 = vmatpush.bf16.msra.mxu1 %v301_v2 }
   0xb   :  { %358 = vmatpush.bf16.msra.mxu2 %v301_v2  ;;  %359 = vmatpush.bf16.msra.mxu3 %v301_v2 }
   0xe   :  { %142 = vmatpush.bf16.msra.mxu0 %v300_v3  ;;  %360 = vmatpush.bf16.msra.mxu1 %v300_v3 }
   0xf   :  { %361 = vmatpush.bf16.msra.mxu2 %v300_v3  ;;  %362 = vmatpush.bf16.msra.mxu3 %v300_v3 }
  0x12   :  { %143 = vmatpush.bf16.msra.mxu0 %v299_v4  ;;  %363 = vmatpush.bf16.msra.mxu1 %v299_v4 }
  0x13   :  { %364 = vmatpush.bf16.msra.mxu2 %v299_v4  ;;  %365 = vmatpush.bf16.msra.mxu3 %v299_v4 }
  0x16   :  { %144 = vmatpush.bf16.msra.mxu0 %v298_v5  ;;  %366 = vmatpush.bf16.msra.mxu1 %v298_v5 }
  0x17   :  { %367 = vmatpush.bf16.msra.mxu2 %v298_v5  ;;  %368 = vmatpush.bf16.msra.mxu3 %v298_v5 }
  0x1a   :  { %145 = vmatpush.bf16.msra.mxu0 %v297_v6  ;;  %369 = vmatpush.bf16.msra.mxu1 %v297_v6 }
  0x1b   :  { %370 = vmatpush.bf16.msra.mxu2 %v297_v6  ;;  %371 = vmatpush.bf16.msra.mxu3 %v297_v6 }
  0x1e   :  { %146 = vmatpush.bf16.msra.mxu0 %v296_v7  ;;  %372 = vmatpush.bf16.msra.mxu1 %v296_v7 }
  0x1f   :  { %373 = vmatpush.bf16.msra.mxu2 %v296_v7  ;;  %374 = vmatpush.bf16.msra.mxu3 %v296_v7 }
  0x21   :  { %147 = vmatmul.bf16.vlgmr.msra.gmra.mxu0 %v288_v8  ;;  %157 = vmatmul.bf16.vlgmr.msra.gmra.mxu1 %v290_v9 }
  0x22   :  { %167 = vmatmul.bf16.vlgmr.msra.gmra.mxu2 %v292_v10  ;;  %177 = vmatmul.bf16.vlgmr.msra.gmra.mxu3 %v294_v11 }
  0x31   :  { %152 = vmatmul.bf16.gmra.mxu0 %v289_v12  ;;  %162 = vmatmul.bf16.gmra.mxu1 %v291_v13 }
  0x32   :  { %172 = vmatmul.bf16.gmra.mxu2 %v293_v14  ;;  %182 = vmatmul.bf16.gmra.mxu3 %v295_v15 }
  0x9e   :  { %v148_v16 = vpop.f32.mrf.mxu0  ;;  %v158_v17 = vpop.f32.mrf.mxu1 }
  0xa5   :  { %v168_v18 = vpop.f32.mrf.mxu2  ;;  %v178_v19 = vpop.f32.mrf.mxu3 }
  0xa6   :  { %v150_v20 = vpop.f32.mrf.mxu0  ;;  %v160_v21 = vpop.f32.mrf.mxu1 }
  0xa7   :  { %v307_v22 = vpack.c.bf16 %v150_v20, %v148_v16  ;;  %v317_v23 = vpack.c.bf16 %v160_v21, %v158_v17 }
  0xa9   :  { %308 = vst [vmem:[%s464_s2] sm:$0xff] %v307_v22  }
  0xaa   :  { %345 = vst [vmem:[%s464_s2 + $0x10] sm:$0xff] %v317_v23  }
  0xad   :  { %v170_v24 = vpop.f32.mrf.mxu2  ;;  %v180_v25 = vpop.f32.mrf.mxu3 }
  0xae   :  { %v327_v26 = vpack.c.bf16 %v170_v24, %v168_v18  ;;  %v337_v27 = vpack.c.bf16 %v180_v25, %v178_v19  ;;  %v153_v28 = vpop.f32.mrf.mxu0  ;;  %v163_v29 = vpop.f32.mrf.mxu1 }
  0xb0   :  { %347 = vst [vmem:[%s464_s2 + $0x20] sm:$0xff] %v327_v26  }
  0xb1   :  { %349 = vst [vmem:[%s464_s2 + $0x30] sm:$0xff] %v337_v27  }
  0xb5   :  { %v173_v30 = vpop.f32.mrf.mxu2  ;;  %v183_v31 = vpop.f32.mrf.mxu3 }
  0xb6   :  { %v155_v32 = vpop.f32.mrf.mxu0  ;;  %v165_v33 = vpop.f32.mrf.mxu1 }
  0xb7   :  { %v312_v34 = vpack.c.bf16 %v155_v32, %v153_v28  ;;  %v322_v35 = vpack.c.bf16 %v165_v33, %v163_v29 }
  0xb9   :  { %344 = vst [vmem:[%s464_s2 + $0x8] sm:$0xff] %v312_v34  }
  0xba   :  { %346 = vst [vmem:[%s464_s2 + $0x18] sm:$0xff] %v322_v35  }
  0xbd   :  { %v175_v36 = vpop.f32.mrf.mxu2  ;;  %v185_v37 = vpop.f32.mrf.mxu3 }
  0xbe   :  { %v332_v38 = vpack.c.bf16 %v175_v36, %v173_v30  ;;  %v342_v39 = vpack.c.bf16 %v185_v37, %v183_v31 }
  0xc0   :  { %348 = vst [vmem:[%s464_s2 + $0x28] sm:$0xff] %v332_v38  }
  0xc1   :  { %350 = vst [vmem:[%s464_s2 + $0x38] sm:$0xff] %v342_v39  }

// kernel: encoder2_forward.3
= control target key start
LH: loop header
LB: loop body
LE: loop exit
PB: predicated region body
PF: predicated region fallthrough
CT: control target
= control target key end

     0   :  { %s666_s1 = inlined_call_operand.vmem [shape: bf16[128,128], index: 1, kind: input, shape index: {}]   ;;  %s667_s2 = inlined_call_operand.vmem [shape: f32[1,128], index: 2, kind: input, shape index: {}]   ;;  %s668_s3 = inlined_call_operand.vmem [shape: f32[1,128], index: 3, kind: input, shape index: {}]   ;;  %s669_s0 = inlined_call_operand.vmem [shape: bf16[128,128], index: 0, kind: input, shape index: {}]   ;;  %s670_s4 = inlined_call_operand.vmem [shape: f32[128,128], index: 4, kind: output, shape index: {}]  }
   0x1   :  { %v467_v0 = vld [vmem:[%s666_s1 + $0x38] sm:$0xff]  ;;  %v466_v1 = vld [vmem:[%s666_s1 + $0x30] sm:$0xff]  ;;  %v465_v2 = vld [vmem:[%s666_s1 + $0x28] sm:$0xff] }
   0x2   :  { %186 = vmatpush.bf16.msra.mxu0 %v467_v0  ;;  %476 = vmatpush.bf16.msra.mxu1 %v467_v0  ;;  %v464_v3 = vld [vmem:[%s666_s1 + $0x20] sm:$0xff]  ;;  %v463_v4 = vld [vmem:[%s666_s1 + $0x18] sm:$0xff]  ;;  %v462_v5 = vld [vmem:[%s666_s1 + $0x10] sm:$0xff] }
   0x3   :  { %477 = vmatpush.bf16.msra.mxu2 %v467_v0  ;;  %478 = vmatpush.bf16.msra.mxu3 %v467_v0  ;;  %v461_v6 = vld [vmem:[%s666_s1 + $0x8] sm:$0xff]  ;;  %v460_v7 = vld [vmem:[%s666_s1] sm:$0xff]  ;;  %v470_v9 = vld [vmem:[%s669_s0 + $0x10] sm:$0xff] }
   0x4   :  { %v468_v8 = vld [vmem:[%s669_s0] sm:$0xff]  ;;  %v474_v11 = vld [vmem:[%s669_s0 + $0x30] sm:$0xff]  ;;  %v469_v12 = vld [vmem:[%s669_s0 + $0x8] sm:$0xff] }
   0x5   :  { %v472_v10 = vld [vmem:[%s669_s0 + $0x20] sm:$0xff]  ;;  %v471_v13 = vld [vmem:[%s669_s0 + $0x18] sm:$0xff]  ;;  %v473_v14 = vld [vmem:[%s669_s0 + $0x28] sm:$0xff] }
   0x6   :  { %187 = vmatpush.bf16.msra.mxu0 %v466_v1  ;;  %479 = vmatpush.bf16.msra.mxu1 %v466_v1  ;;  %v475_v15 = vld [vmem:[%s669_s0 + $0x38] sm:$0xff]  ;;  %v579_v16 = vld [vmem:[%s667_s2] ss:$0 sm:$0xff] }
   0x7   :  { %480 = vmatpush.bf16.msra.mxu2 %v466_v1  ;;  %481 = vmatpush.bf16.msra.mxu3 %v466_v1  ;;  %v585_v20 = vld [vmem:[%s668_s3] ss:$0 sm:$0xff] }
   0xa   :  { %188 = vmatpush.bf16.msra.mxu0 %v465_v2  ;;  %482 = vmatpush.bf16.msra.mxu1 %v465_v2 }
   0xb   :  { %483 = vmatpush.bf16.msra.mxu2 %v465_v2  ;;  %484 = vmatpush.bf16.msra.mxu3 %v465_v2 }
   0xe   :  { %189 = vmatpush.bf16.msra.mxu0 %v464_v3  ;;  %485 = vmatpush.bf16.msra.mxu1 %v464_v3 }
   0xf   :  { %486 = vmatpush.bf16.msra.mxu2 %v464_v3  ;;  %487 = vmatpush.bf16.msra.mxu3 %v464_v3 }
  0x12   :  { %190 = vmatpush.bf16.msra.mxu0 %v463_v4  ;;  %488 = vmatpush.bf16.msra.mxu1 %v463_v4 }
  0x13   :  { %489 = vmatpush.bf16.msra.mxu2 %v463_v4  ;;  %490 = vmatpush.bf16.msra.mxu3 %v463_v4 }
  0x16   :  { %191 = vmatpush.bf16.msra.mxu0 %v462_v5  ;;  %491 = vmatpush.bf16.msra.mxu1 %v462_v5 }
  0x17   :  { %492 = vmatpush.bf16.msra.mxu2 %v462_v5  ;;  %493 = vmatpush.bf16.msra.mxu3 %v462_v5 }
  0x1a   :  { %192 = vmatpush.bf16.msra.mxu0 %v461_v6  ;;  %494 = vmatpush.bf16.msra.mxu1 %v461_v6 }
  0x1b   :  { %495 = vmatpush.bf16.msra.mxu2 %v461_v6  ;;  %496 = vmatpush.bf16.msra.mxu3 %v461_v6 }
  0x1e   :  { %193 = vmatpush.bf16.msra.mxu0 %v460_v7  ;;  %497 = vmatpush.bf16.msra.mxu1 %v460_v7 }
  0x1f   :  { %498 = vmatpush.bf16.msra.mxu2 %v460_v7  ;;  %499 = vmatpush.bf16.msra.mxu3 %v460_v7 }
  0x21   :  { %194 = vmatmul.bf16.vlgmr.msra.gmra.mxu0 %v468_v8  ;;  %204 = vmatmul.bf16.vlgmr.msra.gmra.mxu1 %v470_v9 }
  0x22   :  { %214 = vmatmul.bf16.vlgmr.msra.gmra.mxu2 %v472_v10  ;;  %224 = vmatmul.bf16.vlgmr.msra.gmra.mxu3 %v474_v11 }
  0x31   :  { %199 = vmatmul.bf16.gmra.mxu0 %v469_v12  ;;  %209 = vmatmul.bf16.gmra.mxu1 %v471_v13 }
  0x32   :  { %219 = vmatmul.bf16.gmra.mxu2 %v473_v14  ;;  %229 = vmatmul.bf16.gmra.mxu3 %v475_v15 }
  0x9e   :  { %v195_v17 = vpop.f32.mrf.mxu0  ;;  %v205_v18 = vpop.f32.mrf.mxu1 }
  0x9f   :  { %v290_v19 = vadd.f32 %v579_v16, %v195_v17  ;;  %v294_v21 = vadd.f32 %v579_v16, %v205_v18 }
  0xa1   :  { %v306_v22 = vmax.f32 %v290_v19, 0.0  ;;  %v323_v23 = vmin.f32 %v290_v19, 0.0  ;;  %v310_v24 = vmax.f32 %v294_v21, 0.0  ;;  %v327_v25 = vmin.f32 %v294_v21, 0.0 }
  0xa3   :  { %v342_v26 = vmul.f32 %v585_v20, %v323_v23  ;;  %v346_v27 = vmul.f32 %v585_v20, %v327_v25 }
  0xa5   :  { %v215_v28 = vpop.f32.mrf.mxu2  ;;  %v225_v29 = vpop.f32.mrf.mxu3  ;;  %v358_v32 = vadd.f32 %v342_v26, %v306_v22  ;;  %v362_v33 = vadd.f32 %v346_v27, %v310_v24 }
  0xa6   :  { %v197_v30 = vpop.f32.mrf.mxu0  ;;  %v207_v31 = vpop.f32.mrf.mxu1  ;;  %v298_v34 = vadd.f32 %v579_v16, %v215_v28  ;;  %v302_v35 = vadd.f32 %v579_v16, %v225_v29 }
  0xa7   :  { %374 = vst [vmem:[%s670_s4] sm:$0xff] %v358_v32  ;;  %v291_v36 = vadd.f32 %v579_v16, %v197_v30  ;;  %v295_v37 = vadd.f32 %v579_v16, %v207_v31 }
  0xa8   :  { %378 = vst [vmem:[%s670_s4 + $0x20] sm:$0xff] %v362_v33  ;;  %v331_v38 = vmin.f32 %v298_v34, 0.0  ;;  %v335_v39 = vmin.f32 %v302_v35, 0.0  ;;  %v314_v42 = vmax.f32 %v298_v34, 0.0  ;;  %v318_v44 = vmax.f32 %v302_v35, 0.0 }
  0xa9   :  { %v324_v40 = vmin.f32 %v291_v36, 0.0  ;;  %v328_v41 = vmin.f32 %v295_v37, 0.0  ;;  %v307_v46 = vmax.f32 %v291_v36, 0.0  ;;  %v311_v48 = vmax.f32 %v295_v37, 0.0 }
  0xaa   :  { %v350_v43 = vmul.f32 %v585_v20, %v331_v38  ;;  %v354_v45 = vmul.f32 %v585_v20, %v335_v39 }
  0xab   :  { %v343_v47 = vmul.f32 %v585_v20, %v324_v40  ;;  %v347_v49 = vmul.f32 %v585_v20, %v328_v41 }
  0xac   :  { %v366_v52 = vadd.f32 %v350_v43, %v314_v42  ;;  %v370_v53 = vadd.f32 %v354_v45, %v318_v44 }
  0xad   :  { %v217_v50 = vpop.f32.mrf.mxu2  ;;  %v227_v51 = vpop.f32.mrf.mxu3  ;;  %v359_v56 = vadd.f32 %v343_v47, %v307_v46  ;;  %v363_v57 = vadd.f32 %v347_v49, %v311_v48 }
  0xae   :  { %v200_v54 = vpop.f32.mrf.mxu0  ;;  %v210_v55 = vpop.f32.mrf.mxu1  ;;  %382 = vst [vmem:[%s670_s4 + $0x40] sm:$0xff] %v366_v52  ;;  %v299_v58 = vadd.f32 %v579_v16, %v217_v50  ;;  %v303_v59 = vadd.f32 %v579_v16, %v227_v51 }
  0xaf   :  { %386 = vst [vmem:[%s670_s4 + $0x60] sm:$0xff] %v370_v53  ;;  %v292_v60 = vadd.f32 %v579_v16, %v200_v54  ;;  %v296_v61 = vadd.f32 %v579_v16, %v210_v55 }
  0xb0   :  { %375 = vst [vmem:[%s670_s4 + $0x8] sm:$0xff] %v359_v56  ;;  %v332_v62 = vmin.f32 %v299_v58, 0.0  ;;  %v336_v63 = vmin.f32 %v303_v59, 0.0  ;;  %v315_v4 = vmax.f32 %v299_v58, 0.0  ;;  %v319_v6 = vmax.f32 %v303_v59, 0.0 }
  0xb1   :  { %379 = vst [vmem:[%s670_s4 + $0x28] sm:$0xff] %v363_v57  ;;  %v308_v0 = vmax.f32 %v292_v60, 0.0  ;;  %v325_v1 = vmin.f32 %v292_v60, 0.0  ;;  %v312_v2 = vmax.f32 %v296_v61, 0.0  ;;  %v329_v3 = vmin.f32 %v296_v61, 0.0 }
  0xb2   :  { %v351_v5 = vmul.f32 %v585_v20, %v332_v62  ;;  %v355_v7 = vmul.f32 %v585_v20, %v336_v63 }
  0xb3   :  { %v344_v8 = vmul.f32 %v585_v20, %v325_v1  ;;  %v348_v9 = vmul.f32 %v585_v20, %v329_v3 }
  0xb4   :  { %v367_v12 = vadd.f32 %v351_v5, %v315_v4  ;;  %v371_v13 = vadd.f32 %v355_v7, %v319_v6 }
  0xb5   :  { %v220_v10 = vpop.f32.mrf.mxu2  ;;  %v230_v11 = vpop.f32.mrf.mxu3  ;;  %v360_v17 = vadd.f32 %v344_v8, %v308_v0  ;;  %v364_v18 = vadd.f32 %v348_v9, %v312_v2 }
  0xb6   :  { %v202_v14 = vpop.f32.mrf.mxu0  ;;  %v212_v15 = vpop.f32.mrf.mxu1  ;;  %383 = vst [vmem:[%s670_s4 + $0x48] sm:$0xff] %v367_v12  ;;  %v300_v19 = vadd.f32 %v579_v16, %v220_v10  ;;  %v304_v21 = vadd.f32 %v579_v16, %v230_v11 }
  0xb7   :  { %387 = vst [vmem:[%s670_s4 + $0x68] sm:$0xff] %v371_v13  ;;  %v293_v22 = vadd.f32 %v579_v16, %v202_v14  ;;  %v297_v23 = vadd.f32 %v579_v16, %v212_v15 }
  0xb8   :  { %376 = vst [vmem:[%s670_s4 + $0x10] sm:$0xff] %v360_v17  ;;  %v333_v24 = vmin.f32 %v300_v19, 0.0  ;;  %v337_v25 = vmin.f32 %v304_v21, 0.0  ;;  %v316_v28 = vmax.f32 %v300_v19, 0.0  ;;  %v320_v30 = vmax.f32 %v304_v21, 0.0 }
  0xb9   :  { %380 = vst [vmem:[%s670_s4 + $0x30] sm:$0xff] %v364_v18  ;;  %v326_v26 = vmin.f32 %v293_v22, 0.0  ;;  %v330_v27 = vmin.f32 %v297_v23, 0.0  ;;  %v309_v32 = vmax.f32 %v293_v22, 0.0  ;;  %v313_v34 = vmax.f32 %v297_v23, 0.0 }
  0xba   :  { %v352_v29 = vmul.f32 %v585_v20, %v333_v24  ;;  %v356_v31 = vmul.f32 %v585_v20, %v337_v25 }
  0xbb   :  { %v345_v33 = vmul.f32 %v585_v20, %v326_v26  ;;  %v349_v35 = vmul.f32 %v585_v20, %v330_v27 }
  0xbc   :  { %v368_v38 = vadd.f32 %v352_v29, %v316_v28  ;;  %v372_v39 = vadd.f32 %v356_v31, %v320_v30 }
  0xbd   :  { %v222_v36 = vpop.f32.mrf.mxu2  ;;  %v232_v37 = vpop.f32.mrf.mxu3  ;;  %v361_v40 = vadd.f32 %v345_v33, %v309_v32  ;;  %v365_v41 = vadd.f32 %v349_v35, %v313_v34 }
  0xbe   :  { %384 = vst [vmem:[%s670_s4 + $0x50] sm:$0xff] %v368_v38  ;;  %v301_v42 = vadd.f32 %v579_v16, %v222_v36  ;;  %v305_v43 = vadd.f32 %v579_v16, %v232_v37 }
  0xbf   :  { %388 = vst [vmem:[%s670_s4 + $0x70] sm:$0xff] %v372_v39 }
  0xc0   :  { %377 = vst [vmem:[%s670_s4 + $0x18] sm:$0xff] %v361_v40  ;;  %v334_v44 = vmin.f32 %v301_v42, 0.0  ;;  %v338_v45 = vmin.f32 %v305_v43, 0.0  ;;  %v317_v46 = vmax.f32 %v301_v42, 0.0  ;;  %v321_v48 = vmax.f32 %v305_v43, 0.0 }
  0xc1   :  { %381 = vst [vmem:[%s670_s4 + $0x38] sm:$0xff] %v365_v41 }
  0xc2   :  { %v353_v47 = vmul.f32 %v585_v20, %v334_v44  ;;  %v357_v16 = vmul.f32 %v585_v20, %v338_v45 }
  0xc4   :  { %v369_v49 = vadd.f32 %v353_v47, %v317_v46  ;;  %v373_v50 = vadd.f32 %v357_v16, %v321_v48 }
  0xc6   :  { %385 = vst [vmem:[%s670_s4 + $0x58] sm:$0xff] %v369_v49 }
  0xc7   :  { %389 = vst [vmem:[%s670_s4 + $0x78] sm:$0xff] %v373_v50 }

</bundles_post_ra>
